<compile_context>
chip_gen: v6e
topology: v6e:2x2x1
jax: 0.10.0
libtpu: 0.0.40
codegen_flags: <defaults>
</compile_context>

<pallas_src>
import functools

import jax
import jax.numpy as jnp
from jax.experimental import pallas as pl
from jax.experimental.pallas import tpu as pltpu


# ----------------------------------------------------------------------------
# helpers
# ----------------------------------------------------------------------------

def _round_up(x: int, m: int) -> int:
    return ((x + m - 1) // m) * m


def _pad2d(a, rows: int, cols: int):
    r, c = a.shape
    if r == rows and c == cols:
        return a
    return jnp.pad(a, ((0, rows - r), (0, cols - c)))


def _vmem_limit_bytes() -> int:
    """Per-generation scoped-VMEM limit: ~3/4 of physical per-core VMEM.
    v5e/v6e (128 MiB physical) -> 96 MiB; v7x (64 MiB per TC) -> 48 MiB."""
    cap = 64 * 1024 * 1024                      # conservative default (v7x TC)
    try:
        info = pltpu.get_tpu_info()
        cap = int(getattr(info, "vmem_capacity_bytes", cap))
    except Exception:
        pass
    return (cap * 3) // 4


def _choose_tile_m(M: int) -> int:
    """Largest M tile in {512,...,16} that still yields >= 2 grid steps.
    >=2 steps lets the 'parallel' M axis shard across v7x's two TensorCores
    and gives the pipeline work; big tiles amortize the ~0.35us/step overhead
    and fill the MXU."""
    Ma = _round_up(M, 16)
    for tm in (512, 256, 128, 64, 32, 16):
        if Ma >= 2 * tm:
            return tm
    return Ma                                    # Ma == 16: single tiny tile


def _pick_tile(dim_p: int, pref: int) -> int:
    """Largest multiple of 128 <= pref that divides dim_p (dim_p is a
    multiple of 128, so 128 always works)."""
    t = (min(pref, dim_p) // 128) * 128
    while dim_p % t != 0:
        t -= 128
    return t


def _const_spec(shape, single_buffer: bool):
    """BlockSpec for an operand whose block never changes across the grid
    (weights / biases).  Buffered(1) removes the default 2x double buffer."""
    idx = lambda i: (0,) * len(shape)
    if single_buffer:
        return pl.BlockSpec(shape, idx, pipeline_mode=pl.Buffered(1))
    return pl.BlockSpec(shape, idx)


# ----------------------------------------------------------------------------
# parameters
# ----------------------------------------------------------------------------

def init_ffn_params(key, input_size, hidden_size, output_size, num_layers,
                    dtype=jnp.float32):
    """Deterministic parameter init (PyTorch-Linear-style uniform bounds)."""
    sizes = [(input_size, hidden_size)]
    sizes += [(hidden_size, hidden_size) for _ in range(num_layers - 1)]
    sizes += [(hidden_size, output_size)]

    params = []
    for fan_in, fan_out in sizes:
        key, kw, kb = jax.random.split(key, 3)
        bound = 1.0 / (fan_in ** 0.5)
        w = jax.random.uniform(kw, (fan_in, fan_out), dtype,
                               minval=-bound, maxval=bound)
        b = jax.random.uniform(kb, (fan_out,), dtype,
                               minval=-bound, maxval=bound)
        params.append((w, b))
    return params


def prepare_ffn_params(params):
    """One-time lane-dense padding (feature dims -> multiples of 128) and bf16
    cast of all weights, hoisted off the per-forward path."""
    feat = [params[0][0].shape[0]] + [w.shape[1] for (w, _) in params]
    feat_p = [_round_up(f, 128) for f in feat]
    layers = []
    for li, (w, b) in enumerate(params):
        kp, np_ = feat_p[li], feat_p[li + 1]
        w_p = _pad2d(w, kp, np_).astype(jnp.bfloat16)
        b_p = jnp.pad(b, (0, np_ - b.shape[0])).reshape(1, np_).astype(jnp.float32)
        layers.append((w_p, b_p))
    return dict(layers=tuple(layers), feat=tuple(feat), feat_p=tuple(feat_p))


# ----------------------------------------------------------------------------
# fused whole-MLP kernel (weights resident in VMEM, activations never hit HBM)
# ----------------------------------------------------------------------------

def _fused_mlp_kernel(x_ref, *refs):
    # refs = (w0, b0, w1, b1, ..., wL, bL, o_ref)
    o_ref = refs[-1]
    wb = refs[:-1]
    n_lin = len(wb) // 2

    h = x_ref[...]                                     # bf16 (tile_m, K0p)
    for li in range(n_lin):
        w = wb[2 * li][...]                            # bf16 (Kp, Np)
        b = wb[2 * li + 1][...]                        # f32  (1, Np)
        y = jnp.dot(h, w, preferred_element_type=jnp.float32) + b
        if li < n_lin - 1:
            h = jnp.maximum(y, 0.0).astype(jnp.bfloat16)   # ReLU, back to MXU
        else:
            h = y                                      # final layer: no ReLU
    o_ref[...] = h.astype(o_ref.dtype)


def _fused_resident_bytes(tile_m: int, feat_p, single_buffer_weights: bool) -> int:
    """Peak VMEM estimate for the fused kernel."""
    wmult = 1 if single_buffer_weights else 2
    wb = 0
    for i in range(len(feat_p) - 1):
        wb += (feat_p[i] * feat_p[i + 1] * 2 + feat_p[i + 1] * 4) * wmult
    io = 2 * tile_m * feat_p[0] * 2 + 2 * tile_m * feat_p[-1] * 4   # 2x buffered
    act = tile_m * max(feat_p) * (2 + 4)       # bf16 input + f32 output live
    return wb + io + act


def _fused_ffn(x, prepped, *, tile_m, out_dtype, vmem_limit,
               single_buffer_weights):
    M = x.shape[0]
    feat, feat_p = prepped["feat"], prepped["feat_p"]
    Mp = _round_up(M, tile_m)

    inputs = [_pad2d(x.astype(jnp.bfloat16), Mp, feat_p[0])]
    in_specs = [pl.BlockSpec((tile_m, feat_p[0]), lambda i: (i, 0))]
    for (w_p, b_p) in prepped["layers"]:
        inputs += [w_p, b_p]
        in_specs += [_const_spec(w_p.shape, single_buffer_weights),
                     _const_spec(b_p.shape, single_buffer_weights)]

    out = pl.pallas_call(
        _fused_mlp_kernel,
        out_shape=jax.ShapeDtypeStruct((Mp, feat_p[-1]), out_dtype),
        grid=(Mp // tile_m,),
        in_specs=in_specs,
        out_specs=pl.BlockSpec((tile_m, feat_p[-1]), lambda i: (i, 0)),
        compiler_params=pltpu.CompilerParams(
            dimension_semantics=("parallel",),
            vmem_limit_bytes=int(vmem_limit)),
    )(*inputs)
    return out[:M, :feat[-1]]


# ----------------------------------------------------------------------------
# per-layer M/N/K-tiled linear (fallback for weights too large for fused VMEM)
# ----------------------------------------------------------------------------

def _linear_tiled_kernel(x_ref, w_ref, b_ref, o_ref, acc_ref, *, apply_relu):
    k = pl.program_id(2)

    @pl.when(k == 0)
    def _():
        acc_ref[...] = jnp.zeros_like(acc_ref)

    acc_ref[...] += jnp.dot(x_ref[...], w_ref[...],
                            preferred_element_type=jnp.float32)

    @pl.when(k == pl.num_programs(2) - 1)
    def _():
        y = acc_ref[...] + b_ref[...]                  # bias only at finalize
        if apply_relu:
            y = jnp.maximum(y, 0.0)                    # f32 epilogue
        o_ref[...] = y.astype(o_ref.dtype)


def _linear_tiled_padded(x_p, w_p, b_p, *, apply_relu, out_dtype, tm,
                         vmem_limit, tn_pref=512, tk_pref=512):
    """x_p: (Mp, Kp) bf16 (already padded, Mp % tm == 0); w_p: (Kp, Np) bf16;
    b_p: (1, Np) f32.  Returns the padded (Mp, Np) result in out_dtype."""
    Mp, Kp = x_p.shape
    _, Np = w_p.shape
    tn = _pick_tile(Np, tn_pref)
    tk = _pick_tile(Kp, tk_pref)

    kernel = functools.partial(_linear_tiled_kernel, apply_relu=apply_relu)
    return pl.pallas_call(
        kernel,
        out_shape=jax.ShapeDtypeStruct((Mp, Np), out_dtype),
        grid=(Mp // tm, Np // tn, Kp // tk),
        in_specs=[
            pl.BlockSpec((tm, tk), lambda i, j, k: (i, k)),
            pl.BlockSpec((tk, tn), lambda i, j, k: (k, j)),
            pl.BlockSpec((1, tn), lambda i, j, k: (0, j)),
        ],
        out_specs=pl.BlockSpec((tm, tn), lambda i, j, k: (i, j)),
        scratch_shapes=[pltpu.VMEM((tm, tn), jnp.float32)],
        compiler_params=pltpu.CompilerParams(
            dimension_semantics=("parallel", "parallel", "arbitrary"),
            vmem_limit_bytes=int(vmem_limit)),
    )(x_p, w_p, b_p)


# ----------------------------------------------------------------------------
# module-level forward
# ----------------------------------------------------------------------------

def feed_forward_network(x, params, *, force_tiled: bool = False):
    """Forward pass matching FeedForwardNetwork.forward.

    `params` is either the raw list of (w, b) from init_ffn_params or the
    output of prepare_ffn_params (recommended: pads/casts weights once)."""
    prepped = params if isinstance(params, dict) else prepare_ffn_params(params)
    feat, feat_p = prepped["feat"], prepped["feat_p"]
    assert x.shape[1] == feat[0], (x.shape, feat)

    M = x.shape[0]
    out_dtype = x.dtype
    vmem_limit = _vmem_limit_bytes()
    tile_m = _choose_tile_m(M)

    if not force_tiled:
        budget = int(vmem_limit * 0.8)           # headroom for compiler scratch
        for sbw in (True, False):
            if _fused_resident_bytes(tile_m, feat_p, sbw) > budget:
                continue
            try:
                return _fused_ffn(x, prepped, tile_m=tile_m,
                                  out_dtype=out_dtype, vmem_limit=vmem_limit,
                                  single_buffer_weights=sbw)
            except Exception:
                # e.g. pl.Buffered(1) unsupported on this jax build, or the
                # Python-side VMEM estimate missed -> try next option / tiled.
                continue

    # Large-layer fallback: per-layer M/N/K-tiled matmuls with an f32 VMEM
    # accumulator.  Hidden activations stay padded + bf16 between layers (no
    # wrapper-side pad/cast, no f32 activation round trips through HBM).
    Mp = _round_up(M, tile_m)
    h = _pad2d(x.astype(jnp.bfloat16), Mp, feat_p[0])
    n_lin = len(prepped["layers"])
    for li, (w_p, b_p) in enumerate(prepped["layers"]):
        last = li == n_lin - 1
        h = _linear_tiled_padded(
            h, w_p, b_p, apply_relu=not last,
            out_dtype=(out_dtype if last else jnp.bfloat16),
            tm=tile_m, vmem_limit=vmem_limit)
    return h[:M, :feat[-1]]


# ----------------------------------------------------------------------------
# demo / self-test
# ----------------------------------------------------------------------------

if __name__ == "__main__":
    def ref(x, params):
        h = jnp.maximum(x @ params[0][0] + params[0][1], 0.0)
        for (w, b) in params[1:-1]:
            h = jnp.maximum(h @ w + b, 0.0)
        return h @ params[-1][0] + params[-1][1]

    key = jax.random.PRNGKey(0)

    # 1) small demo shapes -> fused whole-MLP kernel path
    input_size, hidden_size, output_size, num_layers = 16, 32, 8, 3
    batch = 8
    key, kx = jax.random.split(key)
    x = jax.random.normal(kx, (batch, input_size), jnp.float32)
    params = init_ffn_params(key, input_size, hidden_size, output_size,
                             num_layers)
    prepped = prepare_ffn_params(params)        # pad + bf16-cast weights once

    out = jax.block_until_ready(feed_forward_network(x, prepped))
    ref_out = ref(x, params)
    assert out.shape == (batch, output_size)
    # bf16 MXU inputs with f32 accumulation -> relaxed tolerance
    assert jnp.allclose(out, ref_out, atol=2e-2, rtol=2e-2), (
        float(jnp.max(jnp.abs(out - ref_out))))

    # 2) exercise the large-layer tiled fallback (multi-step M/N/K grid,
    #    bf16 hidden activations between layers)
    key, kx2 = jax.random.split(key)
    x2 = jax.random.normal(kx2, (48, 192), jnp.float32)
    params2 = init_ffn_params(key, 192, 640, 96, 2)
    out2 = jax.block_until_ready(
        feed_forward_network(x2, prepare_ffn_params(params2), force_tiled=True))
    ref_out2 = ref(x2, params2)
    assert out2.shape == (48, 96)
    assert jnp.allclose(out2, ref_out2, atol=5e-2, rtol=5e-2), (
        float(jnp.max(jnp.abs(out2 - ref_out2))))

    print("KERNEL_OK")
</pallas_src>

<mosaic_0001>
module attributes {stable_mosaic.version = 11 : i64} {
  func.func @_fused_mlp_kernel(%arg0: i32, %arg1: memref<16x128xbf16, #tpu.memory_space<vmem>>, %arg2: memref<128x128xbf16, #tpu.memory_space<vmem>>, %arg3: memref<1x128xf32, #tpu.memory_space<vmem>>, %arg4: memref<128x128xbf16, #tpu.memory_space<vmem>>, %arg5: memref<1x128xf32, #tpu.memory_space<vmem>>, %arg6: memref<128x128xbf16, #tpu.memory_space<vmem>>, %arg7: memref<1x128xf32, #tpu.memory_space<vmem>>, %arg8: memref<128x128xbf16, #tpu.memory_space<vmem>>, %arg9: memref<1x128xf32, #tpu.memory_space<vmem>>, %arg10: memref<16x128xf32, #tpu.memory_space<vmem>>) attributes {dimension_semantics = [#tpu.dimension_semantics<parallel>], iteration_bounds = array<i64: 1>, scalar_prefetch = 0 : i64, scratch_operands = 0 : i64, tpu.core_type = #tpu.core_type<tc>, window_params = [{transform_indices = @transform_0, window_bounds = array<i64: 16, 128>}, {pipeline_mode = #tpu.pipeline_mode<synchronous>, transform_indices = @transform_1, window_bounds = array<i64: 128, 128>}, {pipeline_mode = #tpu.pipeline_mode<synchronous>, transform_indices = @transform_2, window_bounds = array<i64: 1, 128>}, {pipeline_mode = #tpu.pipeline_mode<synchronous>, transform_indices = @transform_3, window_bounds = array<i64: 128, 128>}, {pipeline_mode = #tpu.pipeline_mode<synchronous>, transform_indices = @transform_4, window_bounds = array<i64: 1, 128>}, {pipeline_mode = #tpu.pipeline_mode<synchronous>, transform_indices = @transform_5, window_bounds = array<i64: 128, 128>}, {pipeline_mode = #tpu.pipeline_mode<synchronous>, transform_indices = @transform_6, window_bounds = array<i64: 1, 128>}, {pipeline_mode = #tpu.pipeline_mode<synchronous>, transform_indices = @transform_7, window_bounds = array<i64: 128, 128>}, {pipeline_mode = #tpu.pipeline_mode<synchronous>, transform_indices = @transform_8, window_bounds = array<i64: 1, 128>}, {transform_indices = @transform_9, window_bounds = array<i64: 16, 128>}]} {
    %c0 = arith.constant 0 : index
    %c0_0 = arith.constant 0 : index
    %0 = vector.load %arg1[%c0, %c0_0] : memref<16x128xbf16, #tpu.memory_space<vmem>>, vector<16x128xbf16>
    %c0_1 = arith.constant 0 : index
    %c0_2 = arith.constant 0 : index
    %1 = vector.load %arg2[%c0_1, %c0_2] : memref<128x128xbf16, #tpu.memory_space<vmem>>, vector<128x128xbf16>
    %c0_3 = arith.constant 0 : index
    %c0_4 = arith.constant 0 : index
    %2 = vector.load %arg3[%c0_3, %c0_4] : memref<1x128xf32, #tpu.memory_space<vmem>>, vector<1x128xf32>
    %cst = arith.constant dense<0.000000e+00> : vector<16x128xf32>
    %3 = tpu.matmul %0, %1, %cst {dimension_numbers = #tpu.dot_dimension_numbers<[1], [0], [0], [1], [0, 0, 1, 1], [], []>} : vector<16x128xbf16>, vector<128x128xbf16>, vector<16x128xf32> -> vector<16x128xf32>
    %4 = vector.broadcast %2 : vector<1x128xf32> to vector<16x128xf32>
    %5 = arith.addf %3, %4 : vector<16x128xf32>
    %cst_5 = arith.constant 0.000000e+00 : f32
    %6 = vector.broadcast %cst_5 : f32 to vector<16x128xf32>
    %7 = arith.maximumf %5, %6 : vector<16x128xf32>
    %8 = arith.truncf %7 : vector<16x128xf32> to vector<16x128xbf16>
    %c0_6 = arith.constant 0 : index
    %c0_7 = arith.constant 0 : index
    %9 = vector.load %arg4[%c0_6, %c0_7] : memref<128x128xbf16, #tpu.memory_space<vmem>>, vector<128x128xbf16>
    %c0_8 = arith.constant 0 : index
    %c0_9 = arith.constant 0 : index
    %10 = vector.load %arg5[%c0_8, %c0_9] : memref<1x128xf32, #tpu.memory_space<vmem>>, vector<1x128xf32>
    %cst_10 = arith.constant dense<0.000000e+00> : vector<16x128xf32>
    %11 = tpu.matmul %8, %9, %cst_10 {dimension_numbers = #tpu.dot_dimension_numbers<[1], [0], [0], [1], [0, 0, 1, 1], [], []>} : vector<16x128xbf16>, vector<128x128xbf16>, vector<16x128xf32> -> vector<16x128xf32>
    %12 = vector.broadcast %10 : vector<1x128xf32> to vector<16x128xf32>
    %13 = arith.addf %11, %12 : vector<16x128xf32>
    %cst_11 = arith.constant 0.000000e+00 : f32
    %14 = vector.broadcast %cst_11 : f32 to vector<16x128xf32>
    %15 = arith.maximumf %13, %14 : vector<16x128xf32>
    %16 = arith.truncf %15 : vector<16x128xf32> to vector<16x128xbf16>
    %c0_12 = arith.constant 0 : index
    %c0_13 = arith.constant 0 : index
    %17 = vector.load %arg6[%c0_12, %c0_13] : memref<128x128xbf16, #tpu.memory_space<vmem>>, vector<128x128xbf16>
    %c0_14 = arith.constant 0 : index
    %c0_15 = arith.constant 0 : index
    %18 = vector.load %arg7[%c0_14, %c0_15] : memref<1x128xf32, #tpu.memory_space<vmem>>, vector<1x128xf32>
    %cst_16 = arith.constant dense<0.000000e+00> : vector<16x128xf32>
    %19 = tpu.matmul %16, %17, %cst_16 {dimension_numbers = #tpu.dot_dimension_numbers<[1], [0], [0], [1], [0, 0, 1, 1], [], []>} : vector<16x128xbf16>, vector<128x128xbf16>, vector<16x128xf32> -> vector<16x128xf32>
    %20 = vector.broadcast %18 : vector<1x128xf32> to vector<16x128xf32>
    %21 = arith.addf %19, %20 : vector<16x128xf32>
    %cst_17 = arith.constant 0.000000e+00 : f32
    %22 = vector.broadcast %cst_17 : f32 to vector<16x128xf32>
    %23 = arith.maximumf %21, %22 : vector<16x128xf32>
    %24 = arith.truncf %23 : vector<16x128xf32> to vector<16x128xbf16>
    %c0_18 = arith.constant 0 : index
    %c0_19 = arith.constant 0 : index
    %25 = vector.load %arg8[%c0_18, %c0_19] : memref<128x128xbf16, #tpu.memory_space<vmem>>, vector<128x128xbf16>
    %c0_20 = arith.constant 0 : index
    %c0_21 = arith.constant 0 : index
    %26 = vector.load %arg9[%c0_20, %c0_21] : memref<1x128xf32, #tpu.memory_space<vmem>>, vector<1x128xf32>
    %cst_22 = arith.constant dense<0.000000e+00> : vector<16x128xf32>
    %27 = tpu.matmul %24, %25, %cst_22 {dimension_numbers = #tpu.dot_dimension_numbers<[1], [0], [0], [1], [0, 0, 1, 1], [], []>} : vector<16x128xbf16>, vector<128x128xbf16>, vector<16x128xf32> -> vector<16x128xf32>
    %28 = vector.broadcast %26 : vector<1x128xf32> to vector<16x128xf32>
    %29 = arith.addf %27, %28 : vector<16x128xf32>
    %c0_23 = arith.constant 0 : index
    %c0_24 = arith.constant 0 : index
    %30 = vector.load %arg10[%c0_23, %c0_24] : memref<16x128xf32, #tpu.memory_space<vmem>>, vector<16x128xf32>
    tpu.vector_store %arg10[%c0_23, %c0_24], %29 {strides = array<i32>} : memref<16x128xf32, #tpu.memory_space<vmem>>, vector<16x128xf32>,
    return
  }
  func.func @transform_0(%arg0: i32) -> (i32, i32) {
    %c0_i32 = arith.constant 0 : i32
    %c0_i32_0 = arith.constant 0 : i32
    return %arg0, %c0_i32 : i32, i32
  }
  func.func @transform_1(%arg0: i32) -> (i32, i32) {
    %c0_i32 = arith.constant 0 : i32
    %c0_i32_0 = arith.constant 0 : i32
    %c0_i32_1 = arith.constant 0 : i32
    return %c0_i32, %c0_i32_0 : i32, i32
  }
  func.func @transform_2(%arg0: i32) -> (i32, i32) {
    %c0_i32 = arith.constant 0 : i32
    %c0_i32_0 = arith.constant 0 : i32
    %c0_i32_1 = arith.constant 0 : i32
    return %c0_i32, %c0_i32_0 : i32, i32
  }
  func.func @transform_3(%arg0: i32) -> (i32, i32) {
    %c0_i32 = arith.constant 0 : i32
    %c0_i32_0 = arith.constant 0 : i32
    %c0_i32_1 = arith.constant 0 : i32
    return %c0_i32, %c0_i32_0 : i32, i32
  }
  func.func @transform_4(%arg0: i32) -> (i32, i32) {
    %c0_i32 = arith.constant 0 : i32
    %c0_i32_0 = arith.constant 0 : i32
    %c0_i32_1 = arith.constant 0 : i32
    return %c0_i32, %c0_i32_0 : i32, i32
  }
  func.func @transform_5(%arg0: i32) -> (i32, i32) {
    %c0_i32 = arith.constant 0 : i32
    %c0_i32_0 = arith.constant 0 : i32
    %c0_i32_1 = arith.constant 0 : i32
    return %c0_i32, %c0_i32_0 : i32, i32
  }
  func.func @transform_6(%arg0: i32) -> (i32, i32) {
    %c0_i32 = arith.constant 0 : i32
    %c0_i32_0 = arith.constant 0 : i32
    %c0_i32_1 = arith.constant 0 : i32
    return %c0_i32, %c0_i32_0 : i32, i32
  }
  func.func @transform_7(%arg0: i32) -> (i32, i32) {
    %c0_i32 = arith.constant 0 : i32
    %c0_i32_0 = arith.constant 0 : i32
    %c0_i32_1 = arith.constant 0 : i32
    return %c0_i32, %c0_i32_0 : i32, i32
  }
  func.func @transform_8(%arg0: i32) -> (i32, i32) {
    %c0_i32 = arith.constant 0 : i32
    %c0_i32_0 = arith.constant 0 : i32
    %c0_i32_1 = arith.constant 0 : i32
    return %c0_i32, %c0_i32_0 : i32, i32
  }
  func.func @transform_9(%arg0: i32) -> (i32, i32) {
    %c0_i32 = arith.constant 0 : i32
    %c0_i32_0 = arith.constant 0 : i32
    return %arg0, %c0_i32 : i32, i32
  }
}

module attributes {stable_mosaic.version = 11 : i64} {
  func.func @_fused_mlp_kernel(%arg0: i32, %arg1: memref<16x128xbf16, #tpu.memory_space<vmem>>, %arg2: memref<128x128xbf16, #tpu.memory_space<vmem>>, %arg3: memref<1x128xf32, #tpu.memory_space<vmem>>, %arg4: memref<128x128xbf16, #tpu.memory_space<vmem>>, %arg5: memref<1x128xf32, #tpu.memory_space<vmem>>, %arg6: memref<128x128xbf16, #tpu.memory_space<vmem>>, %arg7: memref<1x128xf32, #tpu.memory_space<vmem>>, %arg8: memref<128x128xbf16, #tpu.memory_space<vmem>>, %arg9: memref<1x128xf32, #tpu.memory_space<vmem>>, %arg10: memref<16x128xf32, #tpu.memory_space<vmem>>) attributes {dimension_semantics = [#tpu.dimension_semantics<parallel>], iteration_bounds = array<i64: 1>, scalar_prefetch = 0 : i64, scratch_operands = 0 : i64, tpu.core_type = #tpu.core_type<tc>, window_params = [{transform_indices = @transform_0, window_bounds = array<i64: 16, 128>}, {pipeline_mode = #tpu.pipeline_mode<synchronous>, transform_indices = @transform_1, window_bounds = array<i64: 128, 128>}, {pipeline_mode = #tpu.pipeline_mode<synchronous>, transform_indices = @transform_2, window_bounds = array<i64: 1, 128>}, {pipeline_mode = #tpu.pipeline_mode<synchronous>, transform_indices = @transform_3, window_bounds = array<i64: 128, 128>}, {pipeline_mode = #tpu.pipeline_mode<synchronous>, transform_indices = @transform_4, window_bounds = array<i64: 1, 128>}, {pipeline_mode = #tpu.pipeline_mode<synchronous>, transform_indices = @transform_5, window_bounds = array<i64: 128, 128>}, {pipeline_mode = #tpu.pipeline_mode<synchronous>, transform_indices = @transform_6, window_bounds = array<i64: 1, 128>}, {pipeline_mode = #tpu.pipeline_mode<synchronous>, transform_indices = @transform_7, window_bounds = array<i64: 128, 128>}, {pipeline_mode = #tpu.pipeline_mode<synchronous>, transform_indices = @transform_8, window_bounds = array<i64: 1, 128>}, {transform_indices = @transform_9, window_bounds = array<i64: 16, 128>}]} {
    %c0 = arith.constant 0 : index
    %c0_0 = arith.constant 0 : index
    %0 = vector.load %arg1[%c0, %c0_0] : memref<16x128xbf16, #tpu.memory_space<vmem>>, vector<16x128xbf16>
    %c0_1 = arith.constant 0 : index
    %c0_2 = arith.constant 0 : index
    %1 = vector.load %arg2[%c0_1, %c0_2] : memref<128x128xbf16, #tpu.memory_space<vmem>>, vector<128x128xbf16>
    %c0_3 = arith.constant 0 : index
    %c0_4 = arith.constant 0 : index
    %2 = vector.load %arg3[%c0_3, %c0_4] : memref<1x128xf32, #tpu.memory_space<vmem>>, vector<1x128xf32>
    %cst = arith.constant dense<0.000000e+00> : vector<16x128xf32>
    %3 = tpu.matmul %0, %1, %cst {dimension_numbers = #tpu.dot_dimension_numbers<[1], [0], [0], [1], [0, 0, 1, 1], [], []>} : vector<16x128xbf16>, vector<128x128xbf16>, vector<16x128xf32> -> vector<16x128xf32>
    %4 = vector.broadcast %2 : vector<1x128xf32> to vector<16x128xf32>
    %5 = arith.addf %3, %4 : vector<16x128xf32>
    %cst_5 = arith.constant 0.000000e+00 : f32
    %6 = vector.broadcast %cst_5 : f32 to vector<16x128xf32>
    %7 = arith.maximumf %5, %6 : vector<16x128xf32>
    %8 = arith.truncf %7 : vector<16x128xf32> to vector<16x128xbf16>
    %c0_6 = arith.constant 0 : index
    %c0_7 = arith.constant 0 : index
    %9 = vector.load %arg4[%c0_6, %c0_7] : memref<128x128xbf16, #tpu.memory_space<vmem>>, vector<128x128xbf16>
    %c0_8 = arith.constant 0 : index
    %c0_9 = arith.constant 0 : index
    %10 = vector.load %arg5[%c0_8, %c0_9] : memref<1x128xf32, #tpu.memory_space<vmem>>, vector<1x128xf32>
    %cst_10 = arith.constant dense<0.000000e+00> : vector<16x128xf32>
    %11 = tpu.matmul %8, %9, %cst_10 {dimension_numbers = #tpu.dot_dimension_numbers<[1], [0], [0], [1], [0, 0, 1, 1], [], []>} : vector<16x128xbf16>, vector<128x128xbf16>, vector<16x128xf32> -> vector<16x128xf32>
    %12 = vector.broadcast %10 : vector<1x128xf32> to vector<16x128xf32>
    %13 = arith.addf %11, %12 : vector<16x128xf32>
    %cst_11 = arith.constant 0.000000e+00 : f32
    %14 = vector.broadcast %cst_11 : f32 to vector<16x128xf32>
    %15 = arith.maximumf %13, %14 : vector<16x128xf32>
    %16 = arith.truncf %15 : vector<16x128xf32> to vector<16x128xbf16>
    %c0_12 = arith.constant 0 : index
    %c0_13 = arith.constant 0 : index
    %17 = vector.load %arg6[%c0_12, %c0_13] : memref<128x128xbf16, #tpu.memory_space<vmem>>, vector<128x128xbf16>
    %c0_14 = arith.constant 0 : index
    %c0_15 = arith.constant 0 : index
    %18 = vector.load %arg7[%c0_14, %c0_15] : memref<1x128xf32, #tpu.memory_space<vmem>>, vector<1x128xf32>
    %cst_16 = arith.constant dense<0.000000e+00> : vector<16x128xf32>
    %19 = tpu.matmul %16, %17, %cst_16 {dimension_numbers = #tpu.dot_dimension_numbers<[1], [0], [0], [1], [0, 0, 1, 1], [], []>} : vector<16x128xbf16>, vector<128x128xbf16>, vector<16x128xf32> -> vector<16x128xf32>
    %20 = vector.broadcast %18 : vector<1x128xf32> to vector<16x128xf32>
    %21 = arith.addf %19, %20 : vector<16x128xf32>
    %cst_17 = arith.constant 0.000000e+00 : f32
    %22 = vector.broadcast %cst_17 : f32 to vector<16x128xf32>
    %23 = arith.maximumf %21, %22 : vector<16x128xf32>
    %24 = arith.truncf %23 : vector<16x128xf32> to vector<16x128xbf16>
    %c0_18 = arith.constant 0 : index
    %c0_19 = arith.constant 0 : index
    %25 = vector.load %arg8[%c0_18, %c0_19] : memref<128x128xbf16, #tpu.memory_space<vmem>>, vector<128x128xbf16>
    %c0_20 = arith.constant 0 : index
    %c0_21 = arith.constant 0 : index
    %26 = vector.load %arg9[%c0_20, %c0_21] : memref<1x128xf32, #tpu.memory_space<vmem>>, vector<1x128xf32>
    %cst_22 = arith.constant dense<0.000000e+00> : vector<16x128xf32>
    %27 = tpu.matmul %24, %25, %cst_22 {dimension_numbers = #tpu.dot_dimension_numbers<[1], [0], [0], [1], [0, 0, 1, 1], [], []>} : vector<16x128xbf16>, vector<128x128xbf16>, vector<16x128xf32> -> vector<16x128xf32>
    %28 = vector.broadcast %26 : vector<1x128xf32> to vector<16x128xf32>
    %29 = arith.addf %27, %28 : vector<16x128xf32>
    %c0_23 = arith.constant 0 : index
    %c0_24 = arith.constant 0 : index
    %30 = vector.load %arg10[%c0_23, %c0_24] : memref<16x128xf32, #tpu.memory_space<vmem>>, vector<16x128xf32>
    tpu.vector_store %arg10[%c0_23, %c0_24], %29 {strides = array<i32>} : memref<16x128xf32, #tpu.memory_space<vmem>>, vector<16x128xf32>,
    return
  }
  func.func @transform_0(%arg0: i32) -> (i32, i32) {
    %c0_i32 = arith.constant 0 : i32
    %c0_i32_0 = arith.constant 0 : i32
    return %arg0, %c0_i32 : i32, i32
  }
  func.func @transform_1(%arg0: i32) -> (i32, i32) {
    %c0_i32 = arith.constant 0 : i32
    %c0_i32_0 = arith.constant 0 : i32
    %c0_i32_1 = arith.constant 0 : i32
    return %c0_i32, %c0_i32_0 : i32, i32
  }
  func.func @transform_2(%arg0: i32) -> (i32, i32) {
    %c0_i32 = arith.constant 0 : i32
    %c0_i32_0 = arith.constant 0 : i32
    %c0_i32_1 = arith.constant 0 : i32
    return %c0_i32, %c0_i32_0 : i32, i32
  }
  func.func @transform_3(%arg0: i32) -> (i32, i32) {
    %c0_i32 = arith.constant 0 : i32
    %c0_i32_0 = arith.constant 0 : i32
    %c0_i32_1 = arith.constant 0 : i32
    return %c0_i32, %c0_i32_0 : i32, i32
  }
  func.func @transform_4(%arg0: i32) -> (i32, i32) {
    %c0_i32 = arith.constant 0 : i32
    %c0_i32_0 = arith.constant 0 : i32
    %c0_i32_1 = arith.constant 0 : i32
    return %c0_i32, %c0_i32_0 : i32, i32
  }
  func.func @transform_5(%arg0: i32) -> (i32, i32) {
    %c0_i32 = arith.constant 0 : i32
    %c0_i32_0 = arith.constant 0 : i32
    %c0_i32_1 = arith.constant 0 : i32
    return %c0_i32, %c0_i32_0 : i32, i32
  }
  func.func @transform_6(%arg0: i32) -> (i32, i32) {
    %c0_i32 = arith.constant 0 : i32
    %c0_i32_0 = arith.constant 0 : i32
    %c0_i32_1 = arith.constant 0 : i32
    return %c0_i32, %c0_i32_0 : i32, i32
  }
  func.func @transform_7(%arg0: i32) -> (i32, i32) {
    %c0_i32 = arith.constant 0 : i32
    %c0_i32_0 = arith.constant 0 : i32
    %c0_i32_1 = arith.constant 0 : i32
    return %c0_i32, %c0_i32_0 : i32, i32
  }
  func.func @transform_8(%arg0: i32) -> (i32, i32) {
    %c0_i32 = arith.constant 0 : i32
    %c0_i32_0 = arith.constant 0 : i32
    %c0_i32_1 = arith.constant 0 : i32
    return %c0_i32, %c0_i32_0 : i32, i32
  }
  func.func @transform_9(%arg0: i32) -> (i32, i32) {
    %c0_i32 = arith.constant 0 : i32
    %c0_i32_0 = arith.constant 0 : i32
    return %arg0, %c0_i32 : i32, i32
  }
}

module attributes {stable_mosaic.version = 11 : i64} {
  func.func @_linear_tiled_kernel(%arg0: i32, %arg1: i32, %arg2: i32, %arg3: memref<16x128xbf16, #tpu.memory_space<vmem>>, %arg4: memref<128x128xbf16, #tpu.memory_space<vmem>>, %arg5: memref<1x128xf32, #tpu.memory_space<vmem>>, %arg6: memref<16x128xbf16, #tpu.memory_space<vmem>>, %arg7: memref<16x128xf32, #tpu.memory_space<vmem>>) attributes {dimension_semantics = [#tpu.dimension_semantics<parallel>, #tpu.dimension_semantics<parallel>, #tpu.dimension_semantics<arbitrary>], iteration_bounds = array<i64: 1, 1, 1>, scalar_prefetch = 0 : i64, scratch_operands = 1 : i64, tpu.core_type = #tpu.core_type<tc>, window_params = [{transform_indices = @transform_0, window_bounds = array<i64: 16, 128>}, {transform_indices = @transform_1, window_bounds = array<i64: 128, 128>}, {transform_indices = @transform_2, window_bounds = array<i64: 1, 128>}, {transform_indices = @transform_3, window_bounds = array<i64: 16, 128>}]} {
    %c0_i32 = arith.constant 0 : i32
    %0 = arith.cmpi eq, %arg2, %c0_i32 : i32
    %1 = arith.extui %0 : i1 to i32
    %c0_i32_0 = arith.constant 0 : i32
    %2 = arith.cmpi ne, %1, %c0_i32_0 : i32
    scf.if %2 {
      %cst_10 = arith.constant 0.000000e+00 : f32
      %12 = vector.broadcast %cst_10 : f32 to vector<16x128xf32>
      %c0_11 = arith.constant 0 : index
      %c0_12 = arith.constant 0 : index
      %13 = vector.load %arg7[%c0_11, %c0_12] : memref<16x128xf32, #tpu.memory_space<vmem>>, vector<16x128xf32>
      tpu.vector_store %arg7[%c0_11, %c0_12], %12 {strides = array<i32>} : memref<16x128xf32, #tpu.memory_space<vmem>>, vector<16x128xf32>,
    } else {
    }
    %c0 = arith.constant 0 : index
    %c0_1 = arith.constant 0 : index
    %3 = vector.load %arg7[%c0, %c0_1] : memref<16x128xf32, #tpu.memory_space<vmem>>, vector<16x128xf32>
    %c0_2 = arith.constant 0 : index
    %c0_3 = arith.constant 0 : index
    %4 = vector.load %arg3[%c0_2, %c0_3] : memref<16x128xbf16, #tpu.memory_space<vmem>>, vector<16x128xbf16>
    %c0_4 = arith.constant 0 : index
    %c0_5 = arith.constant 0 : index
    %5 = vector.load %arg4[%c0_4, %c0_5] : memref<128x128xbf16, #tpu.memory_space<vmem>>, vector<128x128xbf16>
    %cst = arith.constant dense<0.000000e+00> : vector<16x128xf32>
    %6 = tpu.matmul %4, %5, %cst {dimension_numbers = #tpu.dot_dimension_numbers<[1], [0], [0], [1], [0, 0, 1, 1], [], []>} : vector<16x128xbf16>, vector<128x128xbf16>, vector<16x128xf32> -> vector<16x128xf32>
    %7 = arith.addf %3, %6 : vector<16x128xf32>
    %c0_6 = arith.constant 0 : index
    %c0_7 = arith.constant 0 : index
    %8 = vector.load %arg7[%c0_6, %c0_7] : memref<16x128xf32, #tpu.memory_space<vmem>>, vector<16x128xf32>
    tpu.vector_store %arg7[%c0_6, %c0_7], %7 {strides = array<i32>} : memref<16x128xf32, #tpu.memory_space<vmem>>, vector<16x128xf32>,
    %c0_i32_8 = arith.constant 0 : i32
    %9 = arith.cmpi eq, %arg2, %c0_i32_8 : i32
    %10 = arith.extui %9 : i1 to i32
    %c0_i32_9 = arith.constant 0 : i32
    %11 = arith.cmpi ne, %10, %c0_i32_9 : i32
    scf.if %11 {
      %c0_10 = arith.constant 0 : index
      %c0_11 = arith.constant 0 : index
      %12 = vector.load %arg7[%c0_10, %c0_11] : memref<16x128xf32, #tpu.memory_space<vmem>>, vector<16x128xf32>
      %c0_12 = arith.constant 0 : index
      %c0_13 = arith.constant 0 : index
      %13 = vector.load %arg5[%c0_12, %c0_13] : memref<1x128xf32, #tpu.memory_space<vmem>>, vector<1x128xf32>
      %14 = vector.broadcast %13 : vector<1x128xf32> to vector<16x128xf32>
      %15 = arith.addf %12, %14 : vector<16x128xf32>
      %cst_14 = arith.constant 0.000000e+00 : f32
      %16 = vector.broadcast %cst_14 : f32 to vector<16x128xf32>
      %17 = arith.maximumf %15, %16 : vector<16x128xf32>
      %18 = arith.truncf %17 : vector<16x128xf32> to vector<16x128xbf16>
      %c0_15 = arith.constant 0 : index
      %c0_16 = arith.constant 0 : index
      %19 = vector.load %arg6[%c0_15, %c0_16] : memref<16x128xbf16, #tpu.memory_space<vmem>>, vector<16x128xbf16>
      tpu.vector_store %arg6[%c0_15, %c0_16], %18 {strides = array<i32>} : memref<16x128xbf16, #tpu.memory_space<vmem>>, vector<16x128xbf16>,
    } else {
    }
    return
  }
  func.func @transform_0(%arg0: i32, %arg1: i32, %arg2: i32) -> (i32, i32) {
    %c0_i32 = arith.constant 0 : i32
    return %arg0, %arg2 : i32, i32
  }
  func.func @transform_1(%arg0: i32, %arg1: i32, %arg2: i32) -> (i32, i32) {
    %c0_i32 = arith.constant 0 : i32
    return %arg2, %arg1 : i32, i32
  }
  func.func @transform_2(%arg0: i32, %arg1: i32, %arg2: i32) -> (i32, i32) {
    %c0_i32 = arith.constant 0 : i32
    %c0_i32_0 = arith.constant 0 : i32
    return %c0_i32, %arg1 : i32, i32
  }
  func.func @transform_3(%arg0: i32, %arg1: i32, %arg2: i32) -> (i32, i32) {
    %c0_i32 = arith.constant 0 : i32
    return %arg0, %arg1 : i32, i32
  }
}

</mosaic_0001>

<bundles_post_ra>
// kernel: tpu_custom_call.1
= control target key start
LH: loop header
LB: loop body
LE: loop exit
PB: predicated region body
PF: predicated region fallthrough
CT: control target
= control target key end

     0   :  { %14 = vsyncpa [#allocation3], 0  ;;  %s1061_s0 = inlined_call_operand.hbm [shape: bf16[16,128], index: 0, kind: input, shape index: {}]   ;;  %s1062_s1 = inlined_call_operand.hbm [shape: bf16[128,128], index: 1, kind: input, shape index: {}]   ;;  %s1063_s2 = inlined_call_operand.vmem [shape: f32[1,128], index: 2, kind: input, shape index: {}]   ;;  %s1064_s3 = inlined_call_operand.hbm [shape: bf16[128,128], index: 3, kind: input, shape index: {}]   ;;  %s1065_s4 = inlined_call_operand.vmem [shape: f32[1,128], index: 4, kind: input, shape index: {}]   ;;  %s1066_s5 = inlined_call_operand.hbm [shape: bf16[128,128], index: 5, kind: input, shape index: {}]   ;;  %s1067_s6 = inlined_call_operand.vmem [shape: f32[1,128], index: 6, kind: input, shape index: {}]   ;;  %s1068_s7 = inlined_call_operand.hbm [shape: bf16[128,128], index: 7, kind: input, shape index: {}]   ;;  %s1069_s8 = inlined_call_operand.vmem [shape: f32[1,128], index: 8, kind: input, shape index: {}]   ;;  %s1070_s9 = inlined_call_operand.hbm [shape: f32[16,128], index: 9, kind: output, shape index: {}]  }
   0x1   :  { %15 = vsyncpa [#allocation6], 0 }
   0x2   :  { %16 = vsyncpa [#allocation9], 0 }
   0x3   :  { %17 = vsyncpa [#allocation4], 0  ;;  %s914_s30 = smov [#allocation5]   ;;  %s915_s11 = smov [#allocation8]  }
   0x4   :  { %s35_s10 = sshll.u32 %s914_s30, 4  ;;  %s63_s12 = sshll.u32 %s915_s11, 4  ;;  %s36_s10 = int_to_ptr.vmem [resolvable:$true] %s35_s10  ;;  %s64_s12 = int_to_ptr.vmem [resolvable:$true] %s63_s12 }
   0x5   :  { %s794_s13 = scalar_lea.vmem %s36_s10, 1024  ;;  %p799_p1 = scmp.lt.s32.totalorder %s36_s10, %s36_s10 }
   0x6   :  { %p795_p0 = scmp.ne.s32.totalorder %s36_s10, %s794_s13  ;;  %p800_p2 = scmp.lt.s32.totalorder %s794_s13, %s794_s13 }
   0x8   :  { %p801_p3 = por %p800_p2, %p799_p1 }
   0xa   :  { %p802_p4 = pnand %p801_p3, %p795_p0 }
   0xc   :  { %805 = shalt.err (!%p802_p4)
}
   0xd   :  { %s916_s14 = smov 64   ;;  %s917_s15 = smov 4  }
   0xe   :  { %41 = dma.hbm_to_vmem [thread:$0]  %s1062_s1, 1024, %s36_s10, [#allocation6], %s916_s14, %s916_s14, %s917_s15  }
   0xf   :  { %s814_s18 = scalar_lea.vmem %s64_s12, 1024  ;;  %p819_p6 = scmp.lt.s32.totalorder %s64_s12, %s64_s12 }
  0x10   :  { %p815_p5 = scmp.ne.s32.totalorder %s64_s12, %s814_s18  ;;  %p820_p7 = scmp.lt.s32.totalorder %s814_s18, %s814_s18 }
  0x12   :  { %p821_p8 = por %p820_p7, %p819_p6 }
  0x14   :  { %p822_p9 = pnand %p821_p8, %p815_p5 }
  0x16   :  { %825 = shalt.err (!%p822_p9)
}
  0x17   :  { %69 = dma.hbm_to_vmem [thread:$0]  %s1066_s5, 1024, %s64_s12, [#allocation9], %s916_s14, %s916_s14, %s917_s15  }
  0x18   :  { %s918_s21 = smov [#allocation2]   ;;  %s919_s23 = smov [#allocation7]  }
  0x19   :  { %s23_s22 = sshll.u32 %s918_s21, 4  ;;  %s49_s24 = sshll.u32 %s919_s23, 4  ;;  %s24_s22 = int_to_ptr.vmem [resolvable:$true] %s23_s22  ;;  %s50_s24 = int_to_ptr.vmem [resolvable:$true] %s49_s24 }
  0x1a   :  { %s834_s1 = scalar_lea.vmem %s24_s22, 128  ;;  %p839_p11 = scmp.lt.s32.totalorder %s24_s22, %s24_s22 }
  0x1b   :  { %p835_p10 = scmp.ne.s32.totalorder %s24_s22, %s834_s1  ;;  %p840_p12 = scmp.lt.s32.totalorder %s834_s1, %s834_s1 }
  0x1d   :  { %p841_p13 = por %p840_p12, %p839_p11 }
  0x1f   :  { %p842_p0 = pnand %p841_p13, %p835_p10 }
  0x21   :  { %845 = shalt.err (!%p842_p0)
}
  0x22   :  { %29 = dma.hbm_to_vmem [thread:$0]  %s1061_s0, 128, %s24_s22, [#allocation3], %s916_s14, %s916_s14, %s917_s15  }
  0x23   :  { %s854_s5 = scalar_lea.vmem %s50_s24, 1024  ;;  %p859_p2 = scmp.lt.s32.totalorder %s50_s24, %s50_s24 }
  0x24   :  { %p855_p1 = scmp.ne.s32.totalorder %s50_s24, %s854_s5  ;;  %p860_p3 = scmp.lt.s32.totalorder %s854_s5, %s854_s5 }
  0x26   :  { %p861_p4 = por %p860_p3, %p859_p2 }
  0x28   :  { %p862_p5 = pnand %p861_p4, %p855_p1 }
  0x2a   :  { %865 = shalt.err (!%p862_p5)
}
  0x2b   :  { %55 = dma.hbm_to_vmem [thread:$0]  %s1064_s3, 1024, %s50_s24, [#allocation6], %s916_s14, %s916_s14, %s917_s15  }
  0x2c   :  { %s920_s29 = smov [#allocation10]  }
  0x2d   :  { %s77_s30 = sshll.u32 %s920_s29, 4  ;;  %s78_s30 = int_to_ptr.vmem [resolvable:$true] %s77_s30 }
  0x2e   :  { %s874_s10 = scalar_lea.vmem %s78_s30, 1024  ;;  %p879_p7 = scmp.lt.s32.totalorder %s78_s30, %s78_s30 }
  0x2f   :  { %p875_p6 = scmp.ne.s32.totalorder %s78_s30, %s874_s10  ;;  %p880_p8 = scmp.lt.s32.totalorder %s874_s10, %s874_s10 }
  0x31   :  { %p881_p9 = por %p880_p8, %p879_p7 }
  0x33   :  { %p882_p10 = pnand %p881_p9, %p875_p6 }
  0x35   :  { %885 = shalt.err (!%p882_p10)
}
  0x36   :  { %83 = dma.hbm_to_vmem [thread:$0]  %s1068_s7, 1024, %s78_s30, [#allocation9], %s916_s14, %s916_s14, %s917_s15  }
  0x37   :  { %906 = dma.done.wait [#allocation3], 128  }
  0x38   :  { %907 = vsyncadd [#allocation3], 4294967168 }
  0x39   :  { %908 = dma.done.wait [#allocation6], 2048  }
  0x3a   :  { %909 = vsyncadd [#allocation6], 4294965248 }
  0x3b   :  { %910 = dma.done.wait [#allocation9], 2048  }
  0x3c   :  { %911 = vsyncadd [#allocation9], 4294965248  ;;  %v921_v0 = vmov 0.0   ;;  %vm922_vm0 = vmmov 0   ;;  %v753_v1 = vld [vmem:[#allocation5 + $0x38] sm:$0xff]   ;;  %v754_v2 = vld [vmem:[#allocation5 + $0x30] sm:$0xff]  }
  0x3d   :  { %661 = vmatprep.subr.bf16.mxu0 %v921_v0  ;;  %677 = vmatprep.mubr.msk.bf16.mxu0 %vm922_vm0, %v921_v0  ;;  %v755_v3 = vld [vmem:[#allocation5 + $0x28] sm:$0xff]   ;;  %v762_v4 = vld [vmem:[#allocation7 + $0x38] sm:$0xff]   ;;  %v756_v5 = vld [vmem:[#allocation5 + $0x20] sm:$0xff]   ;;  %s923_s16 = smov [#allocation11]  }
  0x3e   :  { %681 = vmatprep.subr.bf16.mxu1 %v921_v0  ;;  %697 = vmatprep.mubr.msk.bf16.mxu1 %vm922_vm0, %v921_v0  ;;  %v763_v6 = vld [vmem:[#allocation7 + $0x30] sm:$0xff]   ;;  %v757_v7 = vld [vmem:[#allocation5 + $0x18] sm:$0xff]   ;;  %v764_v8 = vld [vmem:[#allocation7 + $0x28] sm:$0xff]   ;;  %s574_s17 = sshll.u32 %s923_s16, 4  ;;  %s575_s17 = int_to_ptr.vmem [resolvable:$true] %s574_s17 }
  0x3f   :  { %662 = vmatpush3.bf16.msra.mxu0 %v753_v1  ;;  %682 = vmatpush3.bf16.msra.mxu1 %v762_v4  ;;  %v758_v9 = vld [vmem:[#allocation5 + $0x10] sm:$0xff]   ;;  %v765_v10 = vld [vmem:[#allocation7 + $0x20] sm:$0xff]   ;;  %v759_v11 = vld [vmem:[#allocation5 + $0x8] sm:$0xff]   ;;  %p891_p12 = scmp.lt.s32.totalorder %s575_s17, %s575_s17 }
  0x40   :  { %663 = vmatprep.subr.bf16.mxu0 %v921_v0  ;;  %683 = vmatprep.subr.bf16.mxu1 %v921_v0  ;;  %v766_v12 = vld [vmem:[#allocation7 + $0x18] sm:$0xff]   ;;  %v760_v13 = vld [vmem:[#allocation5] sm:$0xff]   ;;  %v767_v15 = vld [vmem:[#allocation7 + $0x10] sm:$0xff]  }
  0x41   :  { %v761_v14 = vld [vmem:[#allocation2] sm:$0xff]   ;;  %v768_v16 = vld [vmem:[#allocation7 + $0x8] sm:$0xff]   ;;  %v769_v17 = vld [vmem:[#allocation7] sm:$0xff]  }
  0x42   :  { %v770_v18 = vld [vmem:[#allocation8 + $0x38] sm:$0xff]   ;;  %v771_v19 = vld [vmem:[#allocation8 + $0x30] sm:$0xff]   ;;  %v772_v20 = vld [vmem:[#allocation8 + $0x28] sm:$0xff]  }
  0x43   :  { %664 = vmatpush3.bf16.msra.mxu0 %v754_v2  ;;  %684 = vmatpush3.bf16.msra.mxu1 %v763_v6  ;;  %v773_v21 = vld [vmem:[#allocation8 + $0x20] sm:$0xff]   ;;  %v774_v22 = vld [vmem:[#allocation8 + $0x18] sm:$0xff]   ;;  %v775_v33 = vld [vmem:[#allocation8 + $0x10] sm:$0xff]  }
  0x44   :  { %665 = vmatprep.subr.bf16.mxu0 %v921_v0  ;;  %685 = vmatprep.subr.bf16.mxu1 %v921_v0  ;;  %v588_v23 = vld [vmem:[%s1063_s2] ss:$0 sm:$0xff]  ;;  %v776_v34 = vld [vmem:[#allocation8 + $0x8] sm:$0xff]   ;;  %v777_v35 = vld [vmem:[#allocation8] sm:$0xff]  }
  0x45   :  { %v778_v36 = vld [vmem:[#allocation10 + $0x38] sm:$0xff]   ;;  %v779_v37 = vld [vmem:[#allocation10 + $0x30] sm:$0xff]   ;;  %v780_v38 = vld [vmem:[#allocation10 + $0x28] sm:$0xff]  }
  0x46   :  { %v781_v39 = vld [vmem:[#allocation10 + $0x20] sm:$0xff]   ;;  %v782_v40 = vld [vmem:[#allocation10 + $0x18] sm:$0xff]   ;;  %v783_v51 = vld [vmem:[#allocation10 + $0x10] sm:$0xff]  }
  0x47   :  { %666 = vmatpush3.bf16.msra.mxu0 %v755_v3  ;;  %686 = vmatpush3.bf16.msra.mxu1 %v764_v8  ;;  %v598_v41 = vld [vmem:[%s1065_s4] ss:$0 sm:$0xff]  ;;  %v784_v52 = vld [vmem:[#allocation10 + $0x8] sm:$0xff]   ;;  %v785_v53 = vld [vmem:[#allocation10] sm:$0xff]  }
  0x48   :  { %667 = vmatprep.subr.bf16.mxu0 %v921_v0  ;;  %687 = vmatprep.subr.bf16.mxu1 %v921_v0  ;;  %v607_v54 = vld [vmem:[%s1067_s6] ss:$0 sm:$0xff]  ;;  %s886_s6 = scalar_lea.vmem %s575_s17, 256 }
  0x49   :  { %p887_p11 = scmp.ne.s32.totalorder %s575_s17, %s886_s6  ;;  %p892_p13 = scmp.lt.s32.totalorder %s886_s6, %s886_s6 }
  0x4b   :  { %668 = vmatpush3.bf16.msra.mxu0 %v756_v5  ;;  %688 = vmatpush3.bf16.msra.mxu1 %v765_v10  ;;  %p893_p0 = por %p892_p13, %p891_p12 }
  0x4c   :  { %669 = vmatprep.subr.bf16.mxu0 %v921_v0  ;;  %689 = vmatprep.subr.bf16.mxu1 %v921_v0 }
  0x4d   :  { %p894_p1 = pnand %p893_p0, %p887_p11 }
  0x4f   :  { %670 = vmatpush3.bf16.msra.mxu0 %v757_v7  ;;  %690 = vmatpush3.bf16.msra.mxu1 %v766_v12 }
  0x50   :  { %671 = vmatprep.subr.bf16.mxu0 %v921_v0  ;;  %691 = vmatprep.subr.bf16.mxu1 %v921_v0 }
  0x53   :  { %672 = vmatpush3.bf16.msra.mxu0 %v758_v9  ;;  %692 = vmatpush3.bf16.msra.mxu1 %v767_v15 }
  0x54   :  { %673 = vmatprep.subr.bf16.mxu0 %v921_v0  ;;  %693 = vmatprep.subr.bf16.mxu1 %v921_v0 }
  0x57   :  { %674 = vmatpush3.bf16.msra.mxu0 %v759_v11  ;;  %694 = vmatpush3.bf16.msra.mxu1 %v768_v16 }
  0x58   :  { %675 = vmatprep.subr.bf16.mxu0 %v921_v0  ;;  %695 = vmatprep.subr.bf16.mxu1 %v921_v0 }
  0x5b   :  { %676 = vmatpush3.bf16.msra.mxu0 %v760_v13  ;;  %696 = vmatpush3.bf16.msra.mxu1 %v769_v17 }
  0x5c   :  { %701 = vmatprep.subr.bf16.mxu0 %v921_v0  ;;  %721 = vmatprep.subr.bf16.mxu1 %v921_v0 }
  0x5e   :  { %678 = vmatmul.mubr.bf16.vlgmr.msra.gmra.mxu0 %v761_v14 }
  0x5f   :  { %717 = vmatprep.mubr.msk.bf16.mxu0 %vm922_vm0, %v921_v0  ;;  %702 = vmatpush3.bf16.msra.mxu0 %v770_v18 }
  0x60   :  { %703 = vmatprep.subr.bf16.mxu0 %v921_v0 }
  0x63   :  { %704 = vmatpush3.bf16.msra.mxu0 %v771_v19 }
  0x64   :  { %705 = vmatprep.subr.bf16.mxu0 %v921_v0 }
  0x67   :  { %706 = vmatpush3.bf16.msra.mxu0 %v772_v20 }
  0x68   :  { %707 = vmatprep.subr.bf16.mxu0 %v921_v0 }
  0x6b   :  { %708 = vmatpush3.bf16.msra.mxu0 %v773_v21 }
  0x6c   :  { %709 = vmatprep.subr.bf16.mxu0 %v921_v0 }
  0x6f   :  { %710 = vmatpush3.bf16.msra.mxu0 %v774_v22 }
  0x70   :  { %711 = vmatprep.subr.bf16.mxu0 %v921_v0 }
  0x73   :  { %712 = vmatpush3.bf16.msra.mxu0 %v775_v33 }
  0x74   :  { %713 = vmatprep.subr.bf16.mxu0 %v921_v0 }
  0x77   :  { %714 = vmatpush3.bf16.msra.mxu0 %v776_v34 }
  0x78   :  { %715 = vmatprep.subr.bf16.mxu0 %v921_v0 }
  0x7b   :  { %716 = vmatpush3.bf16.msra.mxu0 %v777_v35 }
 0x11e   :  { %v215_v24 = vpop.f32.mrf.mxu0 }
 0x11f   :  { %v216_v26 = vadd.f32 %v588_v23, %v215_v24 }
 0x120   :  { %v679_v25 = vpop.f32.mrf.mxu0 }
 0x121   :  { %v222_v30 = vmax.f32 %v216_v26, 0.0 }
 0x122   :  { %v218_v27 = vpop.f32.mrf.mxu0 }
 0x123   :  { %v219_v28 = vadd.f32 %v588_v23, %v218_v27 }
 0x124   :  { %v680_v29 = vpop.f32.mrf.mxu0 }
 0x125   :  { %v223_v31 = vmax.f32 %v219_v28, 0.0 }
 0x127   :  { %v224_v32 = vpack.c.bf16 %v223_v31, %v222_v30 }
 0x129   :  { %698 = vmatmul.mubr.bf16.vlgmr.msra.gmra.mxu1 %v224_v32 }
 0x12a   :  { %737 = vmatprep.mubr.msk.bf16.mxu1 %vm922_vm0, %v921_v0  ;;  %722 = vmatpush3.bf16.msra.mxu1 %v778_v36 }
 0x12b   :  { %723 = vmatprep.subr.bf16.mxu1 %v921_v0 }
 0x12e   :  { %724 = vmatpush3.bf16.msra.mxu1 %v779_v37 }
 0x12f   :  { %725 = vmatprep.subr.bf16.mxu1 %v921_v0 }
 0x132   :  { %726 = vmatpush3.bf16.msra.mxu1 %v780_v38 }
 0x133   :  { %727 = vmatprep.subr.bf16.mxu1 %v921_v0 }
 0x136   :  { %728 = vmatpush3.bf16.msra.mxu1 %v781_v39 }
 0x137   :  { %729 = vmatprep.subr.bf16.mxu1 %v921_v0 }
 0x13a   :  { %730 = vmatpush3.bf16.msra.mxu1 %v782_v40 }
 0x13b   :  { %731 = vmatprep.subr.bf16.mxu1 %v921_v0 }
 0x13e   :  { %732 = vmatpush3.bf16.msra.mxu1 %v783_v51 }
 0x13f   :  { %733 = vmatprep.subr.bf16.mxu1 %v921_v0 }
 0x142   :  { %734 = vmatpush3.bf16.msra.mxu1 %v784_v52 }
 0x143   :  { %735 = vmatprep.subr.bf16.mxu1 %v921_v0  ;;  %v616_v0 = vld [vmem:[%s1069_s8] ss:$0 sm:$0xff] }
 0x146   :  { %736 = vmatpush3.bf16.msra.mxu1 %v785_v53 }
 0x1e9   :  { %v330_v42 = vpop.f32.mrf.mxu1 }
 0x1ea   :  { %v331_v44 = vadd.f32 %v598_v41, %v330_v42 }
 0x1eb   :  { %v699_v43 = vpop.f32.mrf.mxu1 }
 0x1ec   :  { %v337_v48 = vmax.f32 %v331_v44, 0.0 }
 0x1ed   :  { %v333_v45 = vpop.f32.mrf.mxu1 }
 0x1ee   :  { %v334_v46 = vadd.f32 %v598_v41, %v333_v45 }
 0x1ef   :  { %v700_v47 = vpop.f32.mrf.mxu1 }
 0x1f0   :  { %v338_v49 = vmax.f32 %v334_v46, 0.0 }
 0x1f2   :  { %v339_v50 = vpack.c.bf16 %v338_v49, %v337_v48 }
 0x1f4   :  { %718 = vmatmul.mubr.bf16.vlgmr.msra.gmra.mxu0 %v339_v50 }
 0x2b4   :  { %v445_v55 = vpop.f32.mrf.mxu0 }
 0x2b5   :  { %v446_v57 = vadd.f32 %v607_v54, %v445_v55 }
 0x2b6   :  { %v719_v56 = vpop.f32.mrf.mxu0 }
 0x2b7   :  { %v452_v61 = vmax.f32 %v446_v57, 0.0 }
 0x2b8   :  { %v448_v58 = vpop.f32.mrf.mxu0 }
 0x2b9   :  { %v449_v59 = vadd.f32 %v607_v54, %v448_v58 }
 0x2ba   :  { %v720_v60 = vpop.f32.mrf.mxu0 }
 0x2bb   :  { %v453_v62 = vmax.f32 %v449_v59, 0.0 }
 0x2bd   :  { %v454_v63 = vpack.c.bf16 %v453_v62, %v452_v61 }
 0x2bf   :  { %738 = vmatmul.mubr.bf16.vlgmr.msra.gmra.mxu1 %v454_v63 }
 0x37f   :  { %v560_v1 = vpop.f32.mrf.mxu1 }
 0x380   :  { %v561_v2 = vadd.f32 %v616_v0, %v560_v1 }
 0x381   :  { %v739_v3 = vpop.f32.mrf.mxu1 }
 0x382   :  { %567 = vst [vmem:[#allocation11] sm:$0xff] %v561_v2 }
 0x383   :  { %v563_v4 = vpop.f32.mrf.mxu1 }
 0x384   :  { %v564_v5 = vadd.f32 %v616_v0, %v563_v4 }
 0x385   :  { %v740_v6 = vpop.f32.mrf.mxu1 }
 0x386   :  { %568 = vst [vmem:[#allocation11 + $0x8] sm:$0xff] %v564_v5 }
 0x387   :  { %897 = shalt.err (!%p894_p1)
}
 0x388   :  { %s924_s18 = smov 128   ;;  %s925_s8 = smov 8  }
 0x389   :  { %580 = dma.vmem_to_hbm [thread:$0]  %s575_s17, 256, %s1070_s9, [#allocation4], %s924_s18, %s924_s18, %s925_s8  }
 0x38a   :  { %912 = dma.done.wait [#allocation4], 256  }
 0x38b   :  { %913 = vsyncadd [#allocation4], 4294967040 }
 0x38c   :  { %584 = vsyncpa [#allocation3], 1 }
 0x38d   :  { %585 = vsyncpa [#allocation6], 1 }
 0x38e   :  { %586 = vsyncpa [#allocation9], 1 }
 0x38f   :  { %587 = vsyncpa [#allocation4], 1 }

// kernel: tpu_custom_call.1
= control target key start
LH: loop header
LB: loop body
LE: loop exit
PB: predicated region body
PF: predicated region fallthrough
CT: control target
= control target key end

     0   :  { %14 = vsyncpa [#allocation3], 0  ;;  %s1061_s0 = inlined_call_operand.hbm [shape: bf16[16,128], index: 0, kind: input, shape index: {}]   ;;  %s1062_s1 = inlined_call_operand.hbm [shape: bf16[128,128], index: 1, kind: input, shape index: {}]   ;;  %s1063_s2 = inlined_call_operand.vmem [shape: f32[1,128], index: 2, kind: input, shape index: {}]   ;;  %s1064_s3 = inlined_call_operand.hbm [shape: bf16[128,128], index: 3, kind: input, shape index: {}]   ;;  %s1065_s4 = inlined_call_operand.vmem [shape: f32[1,128], index: 4, kind: input, shape index: {}]   ;;  %s1066_s5 = inlined_call_operand.hbm [shape: bf16[128,128], index: 5, kind: input, shape index: {}]   ;;  %s1067_s6 = inlined_call_operand.vmem [shape: f32[1,128], index: 6, kind: input, shape index: {}]   ;;  %s1068_s7 = inlined_call_operand.hbm [shape: bf16[128,128], index: 7, kind: input, shape index: {}]   ;;  %s1069_s8 = inlined_call_operand.vmem [shape: f32[1,128], index: 8, kind: input, shape index: {}]   ;;  %s1070_s9 = inlined_call_operand.hbm [shape: f32[16,128], index: 9, kind: output, shape index: {}]  }
   0x1   :  { %15 = vsyncpa [#allocation6], 0 }
   0x2   :  { %16 = vsyncpa [#allocation9], 0 }
   0x3   :  { %17 = vsyncpa [#allocation4], 0  ;;  %s914_s30 = smov [#allocation5]   ;;  %s915_s11 = smov [#allocation8]  }
   0x4   :  { %s35_s10 = sshll.u32 %s914_s30, 4  ;;  %s63_s12 = sshll.u32 %s915_s11, 4  ;;  %s36_s10 = int_to_ptr.vmem [resolvable:$true] %s35_s10  ;;  %s64_s12 = int_to_ptr.vmem [resolvable:$true] %s63_s12 }
   0x5   :  { %s794_s13 = scalar_lea.vmem %s36_s10, 1024  ;;  %p799_p1 = scmp.lt.s32.totalorder %s36_s10, %s36_s10 }
   0x6   :  { %p795_p0 = scmp.ne.s32.totalorder %s36_s10, %s794_s13  ;;  %p800_p2 = scmp.lt.s32.totalorder %s794_s13, %s794_s13 }
   0x8   :  { %p801_p3 = por %p800_p2, %p799_p1 }
   0xa   :  { %p802_p4 = pnand %p801_p3, %p795_p0 }
   0xc   :  { %805 = shalt.err (!%p802_p4)
}
   0xd   :  { %s916_s14 = smov 64   ;;  %s917_s15 = smov 4  }
   0xe   :  { %41 = dma.hbm_to_vmem [thread:$0]  %s1062_s1, 1024, %s36_s10, [#allocation6], %s916_s14, %s916_s14, %s917_s15  }
   0xf   :  { %s814_s18 = scalar_lea.vmem %s64_s12, 1024  ;;  %p819_p6 = scmp.lt.s32.totalorder %s64_s12, %s64_s12 }
  0x10   :  { %p815_p5 = scmp.ne.s32.totalorder %s64_s12, %s814_s18  ;;  %p820_p7 = scmp.lt.s32.totalorder %s814_s18, %s814_s18 }
  0x12   :  { %p821_p8 = por %p820_p7, %p819_p6 }
  0x14   :  { %p822_p9 = pnand %p821_p8, %p815_p5 }
  0x16   :  { %825 = shalt.err (!%p822_p9)
}
  0x17   :  { %69 = dma.hbm_to_vmem [thread:$0]  %s1066_s5, 1024, %s64_s12, [#allocation9], %s916_s14, %s916_s14, %s917_s15  }
  0x18   :  { %s918_s21 = smov [#allocation2]   ;;  %s919_s23 = smov [#allocation7]  }
  0x19   :  { %s23_s22 = sshll.u32 %s918_s21, 4  ;;  %s49_s24 = sshll.u32 %s919_s23, 4  ;;  %s24_s22 = int_to_ptr.vmem [resolvable:$true] %s23_s22  ;;  %s50_s24 = int_to_ptr.vmem [resolvable:$true] %s49_s24 }
  0x1a   :  { %s834_s1 = scalar_lea.vmem %s24_s22, 128  ;;  %p839_p11 = scmp.lt.s32.totalorder %s24_s22, %s24_s22 }
  0x1b   :  { %p835_p10 = scmp.ne.s32.totalorder %s24_s22, %s834_s1  ;;  %p840_p12 = scmp.lt.s32.totalorder %s834_s1, %s834_s1 }
  0x1d   :  { %p841_p13 = por %p840_p12, %p839_p11 }
  0x1f   :  { %p842_p0 = pnand %p841_p13, %p835_p10 }
  0x21   :  { %845 = shalt.err (!%p842_p0)
}
  0x22   :  { %29 = dma.hbm_to_vmem [thread:$0]  %s1061_s0, 128, %s24_s22, [#allocation3], %s916_s14, %s916_s14, %s917_s15  }
  0x23   :  { %s854_s5 = scalar_lea.vmem %s50_s24, 1024  ;;  %p859_p2 = scmp.lt.s32.totalorder %s50_s24, %s50_s24 }
  0x24   :  { %p855_p1 = scmp.ne.s32.totalorder %s50_s24, %s854_s5  ;;  %p860_p3 = scmp.lt.s32.totalorder %s854_s5, %s854_s5 }
  0x26   :  { %p861_p4 = por %p860_p3, %p859_p2 }
  0x28   :  { %p862_p5 = pnand %p861_p4, %p855_p1 }
  0x2a   :  { %865 = shalt.err (!%p862_p5)
}
  0x2b   :  { %55 = dma.hbm_to_vmem [thread:$0]  %s1064_s3, 1024, %s50_s24, [#allocation6], %s916_s14, %s916_s14, %s917_s15  }
  0x2c   :  { %s920_s29 = smov [#allocation10]  }
  0x2d   :  { %s77_s30 = sshll.u32 %s920_s29, 4  ;;  %s78_s30 = int_to_ptr.vmem [resolvable:$true] %s77_s30 }
  0x2e   :  { %s874_s10 = scalar_lea.vmem %s78_s30, 1024  ;;  %p879_p7 = scmp.lt.s32.totalorder %s78_s30, %s78_s30 }
  0x2f   :  { %p875_p6 = scmp.ne.s32.totalorder %s78_s30, %s874_s10  ;;  %p880_p8 = scmp.lt.s32.totalorder %s874_s10, %s874_s10 }
  0x31   :  { %p881_p9 = por %p880_p8, %p879_p7 }
  0x33   :  { %p882_p10 = pnand %p881_p9, %p875_p6 }
  0x35   :  { %885 = shalt.err (!%p882_p10)
}
  0x36   :  { %83 = dma.hbm_to_vmem [thread:$0]  %s1068_s7, 1024, %s78_s30, [#allocation9], %s916_s14, %s916_s14, %s917_s15  }
  0x37   :  { %906 = dma.done.wait [#allocation3], 128  }
  0x38   :  { %907 = vsyncadd [#allocation3], 4294967168 }
  0x39   :  { %908 = dma.done.wait [#allocation6], 2048  }
  0x3a   :  { %909 = vsyncadd [#allocation6], 4294965248 }
  0x3b   :  { %910 = dma.done.wait [#allocation9], 2048  }
  0x3c   :  { %911 = vsyncadd [#allocation9], 4294965248  ;;  %v921_v0 = vmov 0.0   ;;  %vm922_vm0 = vmmov 0   ;;  %v753_v1 = vld [vmem:[#allocation5 + $0x38] sm:$0xff]   ;;  %v754_v2 = vld [vmem:[#allocation5 + $0x30] sm:$0xff]  }
  0x3d   :  { %661 = vmatprep.subr.bf16.mxu0 %v921_v0  ;;  %677 = vmatprep.mubr.msk.bf16.mxu0 %vm922_vm0, %v921_v0  ;;  %v755_v3 = vld [vmem:[#allocation5 + $0x28] sm:$0xff]   ;;  %v762_v4 = vld [vmem:[#allocation7 + $0x38] sm:$0xff]   ;;  %v756_v5 = vld [vmem:[#allocation5 + $0x20] sm:$0xff]   ;;  %s923_s16 = smov [#allocation11]  }
  0x3e   :  { %681 = vmatprep.subr.bf16.mxu1 %v921_v0  ;;  %697 = vmatprep.mubr.msk.bf16.mxu1 %vm922_vm0, %v921_v0  ;;  %v763_v6 = vld [vmem:[#allocation7 + $0x30] sm:$0xff]   ;;  %v757_v7 = vld [vmem:[#allocation5 + $0x18] sm:$0xff]   ;;  %v764_v8 = vld [vmem:[#allocation7 + $0x28] sm:$0xff]   ;;  %s574_s17 = sshll.u32 %s923_s16, 4  ;;  %s575_s17 = int_to_ptr.vmem [resolvable:$true] %s574_s17 }
  0x3f   :  { %662 = vmatpush3.bf16.msra.mxu0 %v753_v1  ;;  %682 = vmatpush3.bf16.msra.mxu1 %v762_v4  ;;  %v758_v9 = vld [vmem:[#allocation5 + $0x10] sm:$0xff]   ;;  %v765_v10 = vld [vmem:[#allocation7 + $0x20] sm:$0xff]   ;;  %v759_v11 = vld [vmem:[#allocation5 + $0x8] sm:$0xff]   ;;  %p891_p12 = scmp.lt.s32.totalorder %s575_s17, %s575_s17 }
  0x40   :  { %663 = vmatprep.subr.bf16.mxu0 %v921_v0  ;;  %683 = vmatprep.subr.bf16.mxu1 %v921_v0  ;;  %v766_v12 = vld [vmem:[#allocation7 + $0x18] sm:$0xff]   ;;  %v760_v13 = vld [vmem:[#allocation5] sm:$0xff]   ;;  %v767_v15 = vld [vmem:[#allocation7 + $0x10] sm:$0xff]  }
  0x41   :  { %v761_v14 = vld [vmem:[#allocation2] sm:$0xff]   ;;  %v768_v16 = vld [vmem:[#allocation7 + $0x8] sm:$0xff]   ;;  %v769_v17 = vld [vmem:[#allocation7] sm:$0xff]  }
  0x42   :  { %v770_v18 = vld [vmem:[#allocation8 + $0x38] sm:$0xff]   ;;  %v771_v19 = vld [vmem:[#allocation8 + $0x30] sm:$0xff]   ;;  %v772_v20 = vld [vmem:[#allocation8 + $0x28] sm:$0xff]  }
  0x43   :  { %664 = vmatpush3.bf16.msra.mxu0 %v754_v2  ;;  %684 = vmatpush3.bf16.msra.mxu1 %v763_v6  ;;  %v773_v21 = vld [vmem:[#allocation8 + $0x20] sm:$0xff]   ;;  %v774_v22 = vld [vmem:[#allocation8 + $0x18] sm:$0xff]   ;;  %v775_v33 = vld [vmem:[#allocation8 + $0x10] sm:$0xff]  }
  0x44   :  { %665 = vmatprep.subr.bf16.mxu0 %v921_v0  ;;  %685 = vmatprep.subr.bf16.mxu1 %v921_v0  ;;  %v588_v23 = vld [vmem:[%s1063_s2] ss:$0 sm:$0xff]  ;;  %v776_v34 = vld [vmem:[#allocation8 + $0x8] sm:$0xff]   ;;  %v777_v35 = vld [vmem:[#allocation8] sm:$0xff]  }
  0x45   :  { %v778_v36 = vld [vmem:[#allocation10 + $0x38] sm:$0xff]   ;;  %v779_v37 = vld [vmem:[#allocation10 + $0x30] sm:$0xff]   ;;  %v780_v38 = vld [vmem:[#allocation10 + $0x28] sm:$0xff]  }
  0x46   :  { %v781_v39 = vld [vmem:[#allocation10 + $0x20] sm:$0xff]   ;;  %v782_v40 = vld [vmem:[#allocation10 + $0x18] sm:$0xff]   ;;  %v783_v51 = vld [vmem:[#allocation10 + $0x10] sm:$0xff]  }
  0x47   :  { %666 = vmatpush3.bf16.msra.mxu0 %v755_v3  ;;  %686 = vmatpush3.bf16.msra.mxu1 %v764_v8  ;;  %v598_v41 = vld [vmem:[%s1065_s4] ss:$0 sm:$0xff]  ;;  %v784_v52 = vld [vmem:[#allocation10 + $0x8] sm:$0xff]   ;;  %v785_v53 = vld [vmem:[#allocation10] sm:$0xff]  }
  0x48   :  { %667 = vmatprep.subr.bf16.mxu0 %v921_v0  ;;  %687 = vmatprep.subr.bf16.mxu1 %v921_v0  ;;  %v607_v54 = vld [vmem:[%s1067_s6] ss:$0 sm:$0xff]  ;;  %s886_s6 = scalar_lea.vmem %s575_s17, 256 }
  0x49   :  { %p887_p11 = scmp.ne.s32.totalorder %s575_s17, %s886_s6  ;;  %p892_p13 = scmp.lt.s32.totalorder %s886_s6, %s886_s6 }
  0x4b   :  { %668 = vmatpush3.bf16.msra.mxu0 %v756_v5  ;;  %688 = vmatpush3.bf16.msra.mxu1 %v765_v10  ;;  %p893_p0 = por %p892_p13, %p891_p12 }
  0x4c   :  { %669 = vmatprep.subr.bf16.mxu0 %v921_v0  ;;  %689 = vmatprep.subr.bf16.mxu1 %v921_v0 }
  0x4d   :  { %p894_p1 = pnand %p893_p0, %p887_p11 }
  0x4f   :  { %670 = vmatpush3.bf16.msra.mxu0 %v757_v7  ;;  %690 = vmatpush3.bf16.msra.mxu1 %v766_v12 }
  0x50   :  { %671 = vmatprep.subr.bf16.mxu0 %v921_v0  ;;  %691 = vmatprep.subr.bf16.mxu1 %v921_v0 }
  0x53   :  { %672 = vmatpush3.bf16.msra.mxu0 %v758_v9  ;;  %692 = vmatpush3.bf16.msra.mxu1 %v767_v15 }
  0x54   :  { %673 = vmatprep.subr.bf16.mxu0 %v921_v0  ;;  %693 = vmatprep.subr.bf16.mxu1 %v921_v0 }
  0x57   :  { %674 = vmatpush3.bf16.msra.mxu0 %v759_v11  ;;  %694 = vmatpush3.bf16.msra.mxu1 %v768_v16 }
  0x58   :  { %675 = vmatprep.subr.bf16.mxu0 %v921_v0  ;;  %695 = vmatprep.subr.bf16.mxu1 %v921_v0 }
  0x5b   :  { %676 = vmatpush3.bf16.msra.mxu0 %v760_v13  ;;  %696 = vmatpush3.bf16.msra.mxu1 %v769_v17 }
  0x5c   :  { %701 = vmatprep.subr.bf16.mxu0 %v921_v0  ;;  %721 = vmatprep.subr.bf16.mxu1 %v921_v0 }
  0x5e   :  { %678 = vmatmul.mubr.bf16.vlgmr.msra.gmra.mxu0 %v761_v14 }
  0x5f   :  { %717 = vmatprep.mubr.msk.bf16.mxu0 %vm922_vm0, %v921_v0  ;;  %702 = vmatpush3.bf16.msra.mxu0 %v770_v18 }
  0x60   :  { %703 = vmatprep.subr.bf16.mxu0 %v921_v0 }
  0x63   :  { %704 = vmatpush3.bf16.msra.mxu0 %v771_v19 }
  0x64   :  { %705 = vmatprep.subr.bf16.mxu0 %v921_v0 }
  0x67   :  { %706 = vmatpush3.bf16.msra.mxu0 %v772_v20 }
  0x68   :  { %707 = vmatprep.subr.bf16.mxu0 %v921_v0 }
  0x6b   :  { %708 = vmatpush3.bf16.msra.mxu0 %v773_v21 }
  0x6c   :  { %709 = vmatprep.subr.bf16.mxu0 %v921_v0 }
  0x6f   :  { %710 = vmatpush3.bf16.msra.mxu0 %v774_v22 }
  0x70   :  { %711 = vmatprep.subr.bf16.mxu0 %v921_v0 }
  0x73   :  { %712 = vmatpush3.bf16.msra.mxu0 %v775_v33 }
  0x74   :  { %713 = vmatprep.subr.bf16.mxu0 %v921_v0 }
  0x77   :  { %714 = vmatpush3.bf16.msra.mxu0 %v776_v34 }
  0x78   :  { %715 = vmatprep.subr.bf16.mxu0 %v921_v0 }
  0x7b   :  { %716 = vmatpush3.bf16.msra.mxu0 %v777_v35 }
 0x11e   :  { %v215_v24 = vpop.f32.mrf.mxu0 }
 0x11f   :  { %v216_v26 = vadd.f32 %v588_v23, %v215_v24 }
 0x120   :  { %v679_v25 = vpop.f32.mrf.mxu0 }
 0x121   :  { %v222_v30 = vmax.f32 %v216_v26, 0.0 }
 0x122   :  { %v218_v27 = vpop.f32.mrf.mxu0 }
 0x123   :  { %v219_v28 = vadd.f32 %v588_v23, %v218_v27 }
 0x124   :  { %v680_v29 = vpop.f32.mrf.mxu0 }
 0x125   :  { %v223_v31 = vmax.f32 %v219_v28, 0.0 }
 0x127   :  { %v224_v32 = vpack.c.bf16 %v223_v31, %v222_v30 }
 0x129   :  { %698 = vmatmul.mubr.bf16.vlgmr.msra.gmra.mxu1 %v224_v32 }
 0x12a   :  { %737 = vmatprep.mubr.msk.bf16.mxu1 %vm922_vm0, %v921_v0  ;;  %722 = vmatpush3.bf16.msra.mxu1 %v778_v36 }
 0x12b   :  { %723 = vmatprep.subr.bf16.mxu1 %v921_v0 }
 0x12e   :  { %724 = vmatpush3.bf16.msra.mxu1 %v779_v37 }
 0x12f   :  { %725 = vmatprep.subr.bf16.mxu1 %v921_v0 }
 0x132   :  { %726 = vmatpush3.bf16.msra.mxu1 %v780_v38 }
 0x133   :  { %727 = vmatprep.subr.bf16.mxu1 %v921_v0 }
 0x136   :  { %728 = vmatpush3.bf16.msra.mxu1 %v781_v39 }
 0x137   :  { %729 = vmatprep.subr.bf16.mxu1 %v921_v0 }
 0x13a   :  { %730 = vmatpush3.bf16.msra.mxu1 %v782_v40 }
 0x13b   :  { %731 = vmatprep.subr.bf16.mxu1 %v921_v0 }
 0x13e   :  { %732 = vmatpush3.bf16.msra.mxu1 %v783_v51 }
 0x13f   :  { %733 = vmatprep.subr.bf16.mxu1 %v921_v0 }
 0x142   :  { %734 = vmatpush3.bf16.msra.mxu1 %v784_v52 }
 0x143   :  { %735 = vmatprep.subr.bf16.mxu1 %v921_v0  ;;  %v616_v0 = vld [vmem:[%s1069_s8] ss:$0 sm:$0xff] }
 0x146   :  { %736 = vmatpush3.bf16.msra.mxu1 %v785_v53 }
 0x1e9   :  { %v330_v42 = vpop.f32.mrf.mxu1 }
 0x1ea   :  { %v331_v44 = vadd.f32 %v598_v41, %v330_v42 }
 0x1eb   :  { %v699_v43 = vpop.f32.mrf.mxu1 }
 0x1ec   :  { %v337_v48 = vmax.f32 %v331_v44, 0.0 }
 0x1ed   :  { %v333_v45 = vpop.f32.mrf.mxu1 }
 0x1ee   :  { %v334_v46 = vadd.f32 %v598_v41, %v333_v45 }
 0x1ef   :  { %v700_v47 = vpop.f32.mrf.mxu1 }
 0x1f0   :  { %v338_v49 = vmax.f32 %v334_v46, 0.0 }
 0x1f2   :  { %v339_v50 = vpack.c.bf16 %v338_v49, %v337_v48 }
 0x1f4   :  { %718 = vmatmul.mubr.bf16.vlgmr.msra.gmra.mxu0 %v339_v50 }
 0x2b4   :  { %v445_v55 = vpop.f32.mrf.mxu0 }
 0x2b5   :  { %v446_v57 = vadd.f32 %v607_v54, %v445_v55 }
 0x2b6   :  { %v719_v56 = vpop.f32.mrf.mxu0 }
 0x2b7   :  { %v452_v61 = vmax.f32 %v446_v57, 0.0 }
 0x2b8   :  { %v448_v58 = vpop.f32.mrf.mxu0 }
 0x2b9   :  { %v449_v59 = vadd.f32 %v607_v54, %v448_v58 }
 0x2ba   :  { %v720_v60 = vpop.f32.mrf.mxu0 }
 0x2bb   :  { %v453_v62 = vmax.f32 %v449_v59, 0.0 }
 0x2bd   :  { %v454_v63 = vpack.c.bf16 %v453_v62, %v452_v61 }
 0x2bf   :  { %738 = vmatmul.mubr.bf16.vlgmr.msra.gmra.mxu1 %v454_v63 }
 0x37f   :  { %v560_v1 = vpop.f32.mrf.mxu1 }
 0x380   :  { %v561_v2 = vadd.f32 %v616_v0, %v560_v1 }
 0x381   :  { %v739_v3 = vpop.f32.mrf.mxu1 }
 0x382   :  { %567 = vst [vmem:[#allocation11] sm:$0xff] %v561_v2 }
 0x383   :  { %v563_v4 = vpop.f32.mrf.mxu1 }
 0x384   :  { %v564_v5 = vadd.f32 %v616_v0, %v563_v4 }
 0x385   :  { %v740_v6 = vpop.f32.mrf.mxu1 }
 0x386   :  { %568 = vst [vmem:[#allocation11 + $0x8] sm:$0xff] %v564_v5 }
 0x387   :  { %897 = shalt.err (!%p894_p1)
}
 0x388   :  { %s924_s18 = smov 128   ;;  %s925_s8 = smov 8  }
 0x389   :  { %580 = dma.vmem_to_hbm [thread:$0]  %s575_s17, 256, %s1070_s9, [#allocation4], %s924_s18, %s924_s18, %s925_s8  }
 0x38a   :  { %912 = dma.done.wait [#allocation4], 256  }
 0x38b   :  { %913 = vsyncadd [#allocation4], 4294967040 }
 0x38c   :  { %584 = vsyncpa [#allocation3], 1 }
 0x38d   :  { %585 = vsyncpa [#allocation6], 1 }
 0x38e   :  { %586 = vsyncpa [#allocation9], 1 }
 0x38f   :  { %587 = vsyncpa [#allocation4], 1 }

// kernel: tpu_custom_call.1
= control target key start
LH: loop header
LB: loop body
LE: loop exit
PB: predicated region body
PF: predicated region fallthrough
CT: control target
= control target key end

     0   :  { %8 = vsyncpa [#allocation4], 0  ;;  %s391_s0 = inlined_call_operand.hbm [shape: bf16[16,128], index: 0, kind: input, shape index: {}]   ;;  %s392_s1 = inlined_call_operand.hbm [shape: bf16[128,128], index: 1, kind: input, shape index: {}]   ;;  %s393_s2 = inlined_call_operand.vmem [shape: f32[1,128], index: 2, kind: input, shape index: {}]   ;;  %s394_s3 = inlined_call_operand.hbm [shape: bf16[16,128], index: 3, kind: output, shape index: {}]  }
   0x1   :  { %9 = vsyncpa [#allocation7], 0 }
   0x2   :  { %10 = vsyncpa [#allocation5], 0  ;;  %s343_s12 = smov [#allocation3]  }
   0x3   :  { %s16_s13 = sshll.u32 %s343_s12, 4  ;;  %s17_s13 = int_to_ptr.vmem [resolvable:$true] %s16_s13 }
   0x4   :  { %s285_s14 = scalar_lea.vmem %s17_s13, 128  ;;  %p290_p1 = scmp.lt.s32.totalorder %s17_s13, %s17_s13 }
   0x5   :  { %p286_p0 = scmp.ne.s32.totalorder %s17_s13, %s285_s14  ;;  %p291_p2 = scmp.lt.s32.totalorder %s285_s14, %s285_s14 }
   0x7   :  { %p292_p3 = por %p291_p2, %p290_p1 }
   0x9   :  { %p293_p4 = pnand %p292_p3, %p286_p0 }
   0xb   :  { %296 = shalt.err (!%p293_p4)
}
   0xc   :  { %s344_s15 = smov 64   ;;  %s345_s16 = smov 4  }
   0xd   :  { %22 = dma.hbm_to_vmem [thread:$0]  %s391_s0, 128, %s17_s13, [#allocation4], %s344_s15, %s344_s15, %s345_s16  }
   0xe   :  { %s346_s19 = smov [#allocation6]  }
   0xf   :  { %s28_s20 = sshll.u32 %s346_s19, 4  ;;  %s29_s20 = int_to_ptr.vmem [resolvable:$true] %s28_s20 }
  0x10   :  { %s305_s21 = scalar_lea.vmem %s29_s20, 1024  ;;  %p310_p6 = scmp.lt.s32.totalorder %s29_s20, %s29_s20 }
  0x11   :  { %p306_p5 = scmp.ne.s32.totalorder %s29_s20, %s305_s21  ;;  %p311_p7 = scmp.lt.s32.totalorder %s305_s21, %s305_s21 }
  0x13   :  { %p312_p8 = por %p311_p7, %p310_p6 }
  0x15   :  { %p313_p9 = pnand %p312_p8, %p306_p5 }
  0x17   :  { %316 = shalt.err (!%p313_p9)
}
  0x18   :  { %34 = dma.hbm_to_vmem [thread:$0]  %s392_s1, 1024, %s29_s20, [#allocation7], %s344_s15, %s344_s15, %s345_s16  }
  0x19   :  { %337 = dma.done.wait [#allocation4], 128  }
  0x1a   :  { %338 = vsyncadd [#allocation4], 4294967168 }
  0x1b   :  { %339 = dma.done.wait [#allocation7], 1024  }
  0x1c   :  { %340 = vsyncadd [#allocation7], 4294966272  ;;  %v347_v0 = vmov 0.0   ;;  %vm348_vm0 = vmmov 0   ;;  %v268_v1 = vld [vmem:[#allocation6 + $0x38] sm:$0xff]   ;;  %v269_v2 = vld [vmem:[#allocation6 + $0x30] sm:$0xff]  }
  0x1d   :  { %241 = vmatprep.subr.bf16.mxu0 %v347_v0  ;;  %257 = vmatprep.mubr.msk.bf16.mxu0 %vm348_vm0, %v347_v0  ;;  %v270_v3 = vld [vmem:[#allocation6 + $0x28] sm:$0xff]   ;;  %v271_v4 = vld [vmem:[#allocation6 + $0x20] sm:$0xff]   ;;  %v272_v5 = vld [vmem:[#allocation6 + $0x18] sm:$0xff]   ;;  %s349_s24 = smov [#allocation8]  }
  0x1e   :  { %242 = vmatpush3.bf16.msra.mxu0 %v268_v1  ;;  %v273_v6 = vld [vmem:[#allocation6 + $0x10] sm:$0xff]   ;;  %v274_v7 = vld [vmem:[#allocation6 + $0x8] sm:$0xff]   ;;  %v275_v8 = vld [vmem:[#allocation6] sm:$0xff]   ;;  %s200_s25 = sshll.u32 %s349_s24, 4  ;;  %s201_s25 = int_to_ptr.vmem [resolvable:$true] %s200_s25 }
  0x1f   :  { %243 = vmatprep.subr.bf16.mxu0 %v347_v0  ;;  %v276_v9 = vld [vmem:[#allocation3] sm:$0xff]   ;;  %s317_s26 = scalar_lea.vmem %s201_s25, 128  ;;  %p322_p11 = scmp.lt.s32.totalorder %s201_s25, %s201_s25 }
  0x20   :  { %v222_v11 = vld [vmem:[%s393_s2] ss:$0 sm:$0xff]  ;;  %p318_p10 = scmp.ne.s32.totalorder %s201_s25, %s317_s26  ;;  %p323_p12 = scmp.lt.s32.totalorder %s317_s26, %s317_s26 }
  0x22   :  { %244 = vmatpush3.bf16.msra.mxu0 %v269_v2  ;;  %p324_p13 = por %p323_p12, %p322_p11 }
  0x23   :  { %245 = vmatprep.subr.bf16.mxu0 %v347_v0 }
  0x24   :  { %p325_p0 = pnand %p324_p13, %p318_p10 }
  0x26   :  { %246 = vmatpush3.bf16.msra.mxu0 %v270_v3 }
  0x27   :  { %247 = vmatprep.subr.bf16.mxu0 %v347_v0 }
  0x2a   :  { %248 = vmatpush3.bf16.msra.mxu0 %v271_v4 }
  0x2b   :  { %249 = vmatprep.subr.bf16.mxu0 %v347_v0 }
  0x2e   :  { %250 = vmatpush3.bf16.msra.mxu0 %v272_v5 }
  0x2f   :  { %251 = vmatprep.subr.bf16.mxu0 %v347_v0 }
  0x32   :  { %252 = vmatpush3.bf16.msra.mxu0 %v273_v6 }
  0x33   :  { %253 = vmatprep.subr.bf16.mxu0 %v347_v0 }
  0x36   :  { %254 = vmatpush3.bf16.msra.mxu0 %v274_v7 }
  0x37   :  { %255 = vmatprep.subr.bf16.mxu0 %v347_v0 }
  0x3a   :  { %256 = vmatpush3.bf16.msra.mxu0 %v275_v8 }
  0x3d   :  { %258 = vmatmul.mubr.bf16.vlgmr.msra.gmra.mxu0 %v276_v9 }
  0xfd   :  { %v158_v10 = vpop.f32.mrf.mxu0 }
  0xfe   :  { %v181_v13 = vadd.f32 %v222_v11, %v158_v10 }
  0xff   :  { %v259_v12 = vpop.f32.mrf.mxu0 }
 0x100   :  { %v183_v17 = vmax.f32 %v181_v13, 0.0 }
 0x101   :  { %v161_v14 = vpop.f32.mrf.mxu0 }
 0x102   :  { %v182_v15 = vadd.f32 %v222_v11, %v161_v14 }
 0x103   :  { %v260_v16 = vpop.f32.mrf.mxu0 }
 0x104   :  { %v184_v18 = vmax.f32 %v182_v15, 0.0 }
 0x106   :  { %v230_v19 = vpack.c.bf16 %v184_v18, %v183_v17 }
 0x108   :  { %231 = vst [vmem:[#allocation8] sm:$0xff] %v230_v19  }
 0x109   :  { %328 = shalt.err (!%p325_p0)
}
 0x10a   :  { %206 = dma.vmem_to_hbm [thread:$0]  %s201_s25, 128, %s394_s3, [#allocation5], %s344_s15, %s344_s15, %s345_s16  }
 0x10b   :  { %341 = dma.done.wait [#allocation5], 128  }
 0x10c   :  { %342 = vsyncadd [#allocation5], 4294967168 }
 0x10d   :  { %210 = vsyncpa [#allocation4], 1 }
 0x10e   :  { %211 = vsyncpa [#allocation7], 1 }
 0x10f   :  { %212 = vsyncpa [#allocation5], 1 }

</bundles_post_ra>
